<compile_context>
chip_gen: v6e
topology: v6e:2x2x1
jax: 0.10.0
libtpu: 0.0.40
codegen_flags: <defaults>
</compile_context>

<pallas_src>
import functools
import math

import jax
import jax.numpy as jnp
from jax.experimental import pallas as pl
from jax.experimental.pallas import tpu as pltpu

SELU_ALPHA = 1.6732632423543772
SELU_SCALE = 1.0507009873554805
BN_EPS = 1e-5
CONV_CH = 4
HID = 10


def _selu(x):
    return SELU_SCALE * jnp.where(x > 0, x, SELU_ALPHA * (jnp.exp(x) - 1.0))


# ------------- pass 1: conv + SELU, BN stats, partial (pool@Linear1) ----------
def _stream_kernel(cw_ref, cb_ref, x_ref, wf_ref, a_ref, stats_ref,
                   *, batch, tb, tiles_per_shard):
    """One pass over an x tile: per-channel SELU(conv), BN sum/sumsq, A_c = z_c @ wf_c."""
    s = pl.program_id(0)
    i = pl.program_id(1)

    @pl.when(i == 0)
    def _():
        stats_ref[...] = jnp.zeros_like(stats_ref)

    x = x_ref[...].astype(jnp.float32)                          # (tb, P)
    row0 = (s * tiles_per_shard + i) * tb
    row = jax.lax.broadcasted_iota(jnp.int32, x.shape, 0) + row0
    valid = row < batch                                         # ragged-tile row mask

    sum_rows, sq_rows = [], []
    for c in range(CONV_CH):                                    # static unroll
        z = _selu(cw_ref[c] * x + cb_ref[c])                    # Conv1d(1,4,1)+SELU, f32
        # Partial contraction against pool+Linear1 folded weights (BN applied later).
        a_ref[c, :, :] = jnp.dot(z.astype(jnp.bfloat16), wf_ref[c],
                                 preferred_element_type=jnp.float32)   # (tb, HID)
        zm = jnp.where(valid, z, 0.0)                           # NaN-safe mask
        sum_rows.append(jnp.sum(zm, axis=0, keepdims=True))     # (1, P)
        sq_rows.append(jnp.sum(zm * zm, axis=0, keepdims=True))
    per_lane = jnp.concatenate(sum_rows + sq_rows, axis=0)       # (2C, P)
    # TODO(synk): E[x^2]-E[x]^2 can cancel for huge batch*point_num; f32 is fine here.
    stats_ref[...] += jnp.sum(per_lane, axis=1, keepdims=True)   # (2C, 1)


# ------------------------------ pass 2: MLP tail ------------------------------
def _tail_kernel(scale_ref, a_ref, b1_ref, w2_ref, b2_ref, w3_ref, b3_ref, o_ref):
    h = scale_ref[0] * a_ref[0]                                 # (tb, HID) f32
    for c in range(1, CONV_CH):
        h = h + scale_ref[c] * a_ref[c]
    h1 = _selu(h + b1_ref[...])
    h2 = _selu(jnp.dot(h1, w2_ref[...], preferred_element_type=jnp.float32)
               + b2_ref[...])
    o_ref[...] = jnp.dot(h2, w3_ref[...],
                         preferred_element_type=jnp.float32) + b3_ref[...]


# --------------------------------- params -----------------------------------
def init_params(key, out_dim, point_num):
    """Deterministic kaiming_uniform_(weight), zeros(bias), as in the module."""
    half = point_num // 2
    k1, k2, k3, k4 = jax.random.split(key, 4)

    def kaiming_uniform(k, shape, fan_in):
        bound = math.sqrt(6.0 / fan_in)                         # gain=sqrt(2), a=0
        return jax.random.uniform(k, shape, jnp.float32, -bound, bound)

    cw = kaiming_uniform(k1, (CONV_CH,), 1)                     # Conv1d weight (4,1,1)
    cb = jnp.zeros((CONV_CH,), jnp.float32)
    w1 = kaiming_uniform(k2, (HID, CONV_CH * half), CONV_CH * half)
    b1 = jnp.zeros((HID,), jnp.float32)
    w2 = kaiming_uniform(k3, (HID, HID), HID)
    b2 = jnp.zeros((HID,), jnp.float32)
    w3 = kaiming_uniform(k4, (out_dim, HID), HID)
    b3 = jnp.zeros((out_dim,), jnp.float32)
    return (cw, cb, w1, b1, w2, b2, w3, b3)


# ------------------------------ tiling helpers -------------------------------
def _vmem_plan():
    """(tile-sizing budget, scoped-VMEM limit) in bytes for the local chip."""
    cap = 64 * 1024 * 1024                       # conservative default: v7x per-core VMEM
    try:
        got = int(getattr(pltpu.get_tpu_info(), "vmem_capacity_bytes", 0))
        if got > 0:
            cap = got
    except Exception:
        pass
    budget = min(int(cap * 0.5), 64 * 1024 * 1024)
    limit = max(min(int(cap * 0.85), budget + (16 << 20), 100 << 20), 32 << 20)
    return budget, limit


def _pick_batch_tile(batch, point_num, x_itemsize, vmem_budget):
    """Largest batch tile (multiple of 8, <=1024 rows) fitting the VMEM budget."""
    per_row = ((2 * x_itemsize + 16) * point_num    # x double-buffer + f32 copy + channel temps
               + 2 * CONV_CH * HID * 4)             # double-buffered (C, tb, HID) f32 output
    fixed = CONV_CH * point_num * HID * 2 + (2 << 20)   # folded bf16 weights + slack
    tb = (vmem_budget - fixed) // max(per_row, 1)
    tb = int(max(8, min(1024, tb)) // 8 * 8)
    if batch <= tb:
        return batch                                 # single tile == full batch
    return tb


# --------------------------------- wrapper ----------------------------------
def mecnn_n0_forward(x, params):
    cw, cb, w1, b1, w2, b2, w3, b3 = params
    batch = x.shape[0]
    x = x.reshape(batch, -1)                         # x.view(B, 1, -1)
    if x.dtype not in (jnp.float32, jnp.bfloat16, jnp.float16):
        x = x.astype(jnp.float32)                    # module casts to f32
    point_num = x.shape[1]
    half = point_num // 2
    out_dim = w3.shape[0]

    vmem_budget, vmem_limit = _vmem_plan()
    tb = _pick_batch_tile(batch, point_num, x.dtype.itemsize, vmem_budget)

    # Shard the stats pass across 2 TensorCores (v7x megacore) only when the tile
    # count splits exactly (no phantom tiles); nudge tb down to find an even count.
    ntiles = -(-batch // tb)
    num_shards = 1
    if ntiles >= 2:
        if ntiles % 2:
            t = tb - 8
            while t >= max(8, tb - 256):
                if (-(-batch // t)) % 2 == 0:
                    tb = t
                    ntiles = -(-batch // t)
                    break
                t -= 8
        if ntiles % 2 == 0:
            num_shards = 2
    tiles_per_shard = ntiles // num_shards

    # Fold AvgPool1d(2) into Linear1, kept per conv channel (channel-major flatten):
    #   wf[c, p, h] = 0.5 * w1[h, c*half + p//2]  for p < 2*half, else 0 (odd tail dropped).
    w1_blocks = jnp.transpose(w1.reshape(HID, CONV_CH, half), (1, 2, 0))   # (C, half, HID)
    wf = 0.5 * jnp.repeat(w1_blocks, 2, axis=1)                            # (C, 2*half, HID)
    if point_num > 2 * half:
        wf = jnp.pad(wf, ((0, 0), (0, point_num - 2 * half), (0, 0)))
    wf_bf = wf.astype(jnp.bfloat16)                                        # (C, P, HID)

    smem = pl.BlockSpec(memory_space=pltpu.MemorySpace.SMEM)
    vmem = pl.BlockSpec(memory_space=pltpu.MemorySpace.VMEM)
    x_spec = pl.BlockSpec((tb, point_num),
                          lambda s, i: (s * tiles_per_shard + i, 0))

    # Pass 1: stream x once; per-channel SELU(conv), BN sums, partial contraction A.
    a_part, stats = pl.pallas_call(
        functools.partial(_stream_kernel, batch=batch, tb=tb,
                          tiles_per_shard=tiles_per_shard),
        grid=(num_shards, tiles_per_shard),
        in_specs=[smem, smem, x_spec, vmem],
        out_specs=[
            pl.BlockSpec((CONV_CH, tb, HID),
                         lambda s, i: (0, s * tiles_per_shard + i, 0)),
            pl.BlockSpec((2 * CONV_CH, 1), lambda s, i: (s, 0)),
        ],
        out_shape=[
            jax.ShapeDtypeStruct((CONV_CH, batch, HID), jnp.float32),
            jax.ShapeDtypeStruct((num_shards * 2 * CONV_CH, 1), jnp.float32),
        ],
        compiler_params=pltpu.CompilerParams(
            dimension_semantics=("parallel", "arbitrary"),
            vmem_limit_bytes=vmem_limit),
    )(cw, cb, x, wf_bf)

    # Finalize BN stats (tiny) and fold BN into a post-contraction affine.
    st = stats.reshape(num_shards, 2 * CONV_CH).sum(axis=0)
    n = float(batch * point_num)
    mean = st[:CONV_CH] / n
    var = st[CONV_CH:] / n - mean * mean                      # biased (train-mode BN)
    inv_std = jax.lax.rsqrt(var + BN_EPS)                     # (C,)
    colsum = wf_bf.astype(jnp.float32).sum(axis=1)            # (C, HID), matches kernel's bf16 wf
    b1_eff = (b1[None, :]
              - jnp.einsum("c,ch->h", inv_std * mean, colsum)[None, :]).astype(jnp.float32)

    # Pass 2: MLP tail over A (never touches x).
    out = pl.pallas_call(
        _tail_kernel,
        grid=(ntiles,),
        in_specs=[smem,
                  pl.BlockSpec((CONV_CH, tb, HID), lambda i: (0, i, 0)),
                  vmem, vmem, vmem, vmem, vmem],
        out_specs=pl.BlockSpec((tb, out_dim), lambda i: (i, 0)),
        out_shape=jax.ShapeDtypeStruct((batch, out_dim), jnp.float32),
        compiler_params=pltpu.CompilerParams(
            dimension_semantics=("parallel",),
            vmem_limit_bytes=vmem_limit),
    )(inv_std, a_part, b1_eff, w2.T, b2[None, :], w3.T, b3[None, :])
    return out


# ------------------------- pure-JAX reference (check) ------------------------
def _reference(x, params):
    cw, cb, w1, b1, w2, b2, w3, b3 = params
    x = x.astype(jnp.float32).reshape(x.shape[0], -1)
    z = _selu(cw[None, :, None] * x[:, None, :] + cb[None, :, None])   # (B, 4, P)
    mean = z.mean(axis=(0, 2), keepdims=True)
    var = z.var(axis=(0, 2), keepdims=True)                            # biased
    zn = (z - mean) * jax.lax.rsqrt(var + BN_EPS)
    half = x.shape[-1] // 2
    pooled = 0.5 * (zn[..., : 2 * half: 2] + zn[..., 1: 2 * half: 2])  # AvgPool1d(2)
    flat = pooled.reshape(x.shape[0], -1)
    h1 = _selu(flat @ w1.T + b1)
    h2 = _selu(h1 @ w2.T + b2)
    return h2 @ w3.T + b3


if __name__ == "__main__":
    out_dim, point_num, batch = 4, 16, 2
    key = jax.random.PRNGKey(0)
    pkey, xkey = jax.random.split(key)

    params = init_params(pkey, out_dim, point_num)
    x = jax.random.normal(xkey, (batch, point_num), jnp.float32)

    out = mecnn_n0_forward(x, params)
    jax.block_until_ready(out)
    assert out.shape == (batch, out_dim) and out.dtype == jnp.float32

    ref = _reference(x, params)
    assert float(jnp.max(jnp.abs(out - ref))) < 5e-2   # bf16 contraction tolerance
    print("KERNEL_OK")
</pallas_src>

<mosaic_0001>
module attributes {stable_mosaic.version = 11 : i64} {
  func.func @_stream_kernel(%arg0: i32, %arg1: i32, %arg2: memref<4xf32, #tpu.memory_space<smem>>, %arg3: memref<4xf32, #tpu.memory_space<smem>>, %arg4: memref<2x16xf32, #tpu.memory_space<vmem>>, %arg5: memref<4x16x10xbf16, #tpu.memory_space<vmem>>, %arg6: memref<4x2x10xf32, #tpu.memory_space<vmem>>, %arg7: memref<8x1xf32, #tpu.memory_space<vmem>>) attributes {dimension_semantics = [#tpu.dimension_semantics<parallel>, #tpu.dimension_semantics<arbitrary>], iteration_bounds = array<i64: 1, 1>, scalar_prefetch = 0 : i64, scratch_operands = 0 : i64, tpu.core_type = #tpu.core_type<tc>, window_params = [{transform_indices = @transform_0, window_bounds = array<i64: 4>}, {transform_indices = @transform_1, window_bounds = array<i64: 4>}, {transform_indices = @transform_2, window_bounds = array<i64: 2, 16>}, {pipeline_mode = #tpu.pipeline_mode<synchronous>, transform_indices = @transform_3, window_bounds = array<i64: 4, 16, 10>}, {transform_indices = @transform_4, window_bounds = array<i64: 4, 2, 10>}, {transform_indices = @transform_5, window_bounds = array<i64: 8, 1>}]} {
    %c0_i32 = arith.constant 0 : i32
    %0 = arith.cmpi eq, %arg1, %c0_i32 : i32
    %1 = arith.extui %0 : i1 to i32
    %c0_i32_0 = arith.constant 0 : i32
    %2 = arith.cmpi ne, %1, %c0_i32_0 : i32
    scf.if %2 {
      %cst_68 = arith.constant 0.000000e+00 : f32
      %138 = vector.broadcast %cst_68 : f32 to vector<8x1xf32>
      %c0_69 = arith.constant 0 : index
      %c0_70 = arith.constant 0 : index
      %139 = vector.load %arg7[%c0_69, %c0_70] : memref<8x1xf32, #tpu.memory_space<vmem>>, vector<8x1xf32>
      tpu.vector_store %arg7[%c0_69, %c0_70], %138 {strides = array<i32>} : memref<8x1xf32, #tpu.memory_space<vmem>>, vector<8x1xf32>,
    } else {
    }
    %c0 = arith.constant 0 : index
    %c0_1 = arith.constant 0 : index
    %3 = vector.load %arg4[%c0, %c0_1] : memref<2x16xf32, #tpu.memory_space<vmem>>, vector<2x16xf32>
    %c1_i32 = arith.constant 1 : i32
    %4 = arith.muli %arg0, %c1_i32 : i32
    %5 = arith.addi %4, %arg1 : i32
    %c2_i32 = arith.constant 2 : i32
    %6 = arith.muli %5, %c2_i32 : i32
    %7 = tpu.iota {dimensions = array<i32: 0>} : vector<2x16xi32>
    %8 = vector.broadcast %6 : i32 to vector<2x16xi32>
    %9 = arith.addi %7, %8 : vector<2x16xi32>
    %c2_i32_2 = arith.constant 2 : i32
    %10 = vector.broadcast %c2_i32_2 : i32 to vector<2x16xi32>
    %11 = arith.cmpi slt, %9, %10 : vector<2x16xi32>
    %c0_3 = arith.constant 0 : index
    %12 = memref.load %arg2[%c0_3] : memref<4xf32, #tpu.memory_space<smem>>
    %13 = vector.broadcast %12 : f32 to vector<2x16xf32>
    %14 = arith.mulf %13, %3 : vector<2x16xf32>
    %c0_4 = arith.constant 0 : index
    %15 = memref.load %arg3[%c0_4] : memref<4xf32, #tpu.memory_space<smem>>
    %16 = vector.broadcast %15 : f32 to vector<2x16xf32>
    %17 = arith.addf %14, %16 : vector<2x16xf32>
    %cst = arith.constant 0.000000e+00 : f32
    %18 = vector.broadcast %cst : f32 to vector<2x16xf32>
    %19 = arith.cmpf ogt, %17, %18 : vector<2x16xf32>
    %20 = math.exp %17 : vector<2x16xf32>
    %cst_5 = arith.constant 1.000000e+00 : f32
    %21 = vector.broadcast %cst_5 : f32 to vector<2x16xf32>
    %22 = arith.subf %20, %21 : vector<2x16xf32>
    %cst_6 = arith.constant 1.67326319 : f32
    %23 = vector.broadcast %cst_6 : f32 to vector<2x16xf32>
    %24 = arith.mulf %23, %22 : vector<2x16xf32>
    %25 = arith.select %19, %17, %24 : vector<2x16xi1>, vector<2x16xf32>
    %cst_7 = arith.constant 1.05070102 : f32
    %26 = vector.broadcast %cst_7 : f32 to vector<2x16xf32>
    %27 = arith.mulf %26, %25 : vector<2x16xf32>
    %28 = arith.truncf %27 : vector<2x16xf32> to vector<2x16xbf16>
    %c0_8 = arith.constant 0 : index
    %c0_9 = arith.constant 0 : index
    %c0_10 = arith.constant 0 : index
    %29 = vector.load %arg5[%c0_8, %c0_9, %c0_10] : memref<4x16x10xbf16, #tpu.memory_space<vmem>>, vector<1x16x10xbf16>
    %30 = vector.shape_cast %29 : vector<1x16x10xbf16> to vector<16x10xbf16>
    %cst_11 = arith.constant dense<0.000000e+00> : vector<2x10xf32>
    %31 = tpu.matmul %28, %30, %cst_11 {dimension_numbers = #tpu.dot_dimension_numbers<[1], [0], [0], [1], [0, 0, 1, 1], [], []>} : vector<2x16xbf16>, vector<16x10xbf16>, vector<2x10xf32> -> vector<2x10xf32>
    %c0_12 = arith.constant 0 : index
    %c0_13 = arith.constant 0 : index
    %c0_14 = arith.constant 0 : index
    %32 = vector.load %arg6[%c0_12, %c0_13, %c0_14] : memref<4x2x10xf32, #tpu.memory_space<vmem>>, vector<1x2x10xf32>
    %33 = vector.shape_cast %32 : vector<1x2x10xf32> to vector<2x10xf32>
    %34 = vector.shape_cast %31 : vector<2x10xf32> to vector<1x2x10xf32>
    tpu.vector_store %arg6[%c0_12, %c0_13, %c0_14], %34 {strides = array<i32>} : memref<4x2x10xf32, #tpu.memory_space<vmem>>, vector<1x2x10xf32>,
    %cst_15 = arith.constant 0.000000e+00 : f32
    %35 = vector.broadcast %cst_15 : f32 to vector<2x16xf32>
    %36 = arith.select %11, %27, %35 : vector<2x16xi1>, vector<2x16xf32>
    %cst_16 = arith.constant dense<0.000000e+00> : vector<16xf32>
    %37 = vector.multi_reduction <add>, %36, %cst_16 [0] : vector<2x16xf32> to vector<16xf32>
    %38 = vector.shape_cast %37 : vector<16xf32> to vector<1x16xf32>
    %39 = arith.mulf %36, %36 : vector<2x16xf32>
    %cst_17 = arith.constant dense<0.000000e+00> : vector<16xf32>
    %40 = vector.multi_reduction <add>, %39, %cst_17 [0] : vector<2x16xf32> to vector<16xf32>
    %41 = vector.shape_cast %40 : vector<16xf32> to vector<1x16xf32>
    %c1 = arith.constant 1 : index
    %42 = memref.load %arg2[%c1] : memref<4xf32, #tpu.memory_space<smem>>
    %43 = vector.broadcast %42 : f32 to vector<2x16xf32>
    %44 = arith.mulf %43, %3 : vector<2x16xf32>
    %c1_18 = arith.constant 1 : index
    %45 = memref.load %arg3[%c1_18] : memref<4xf32, #tpu.memory_space<smem>>
    %46 = vector.broadcast %45 : f32 to vector<2x16xf32>
    %47 = arith.addf %44, %46 : vector<2x16xf32>
    %cst_19 = arith.constant 0.000000e+00 : f32
    %48 = vector.broadcast %cst_19 : f32 to vector<2x16xf32>
    %49 = arith.cmpf ogt, %47, %48 : vector<2x16xf32>
    %50 = math.exp %47 : vector<2x16xf32>
    %cst_20 = arith.constant 1.000000e+00 : f32
    %51 = vector.broadcast %cst_20 : f32 to vector<2x16xf32>
    %52 = arith.subf %50, %51 : vector<2x16xf32>
    %cst_21 = arith.constant 1.67326319 : f32
    %53 = vector.broadcast %cst_21 : f32 to vector<2x16xf32>
    %54 = arith.mulf %53, %52 : vector<2x16xf32>
    %55 = arith.select %49, %47, %54 : vector<2x16xi1>, vector<2x16xf32>
    %cst_22 = arith.constant 1.05070102 : f32
    %56 = vector.broadcast %cst_22 : f32 to vector<2x16xf32>
    %57 = arith.mulf %56, %55 : vector<2x16xf32>
    %58 = arith.truncf %57 : vector<2x16xf32> to vector<2x16xbf16>
    %c1_23 = arith.constant 1 : index
    %c0_24 = arith.constant 0 : index
    %c0_25 = arith.constant 0 : index
    %59 = vector.load %arg5[%c1_23, %c0_24, %c0_25] : memref<4x16x10xbf16, #tpu.memory_space<vmem>>, vector<1x16x10xbf16>
    %60 = vector.shape_cast %59 : vector<1x16x10xbf16> to vector<16x10xbf16>
    %cst_26 = arith.constant dense<0.000000e+00> : vector<2x10xf32>
    %61 = tpu.matmul %58, %60, %cst_26 {dimension_numbers = #tpu.dot_dimension_numbers<[1], [0], [0], [1], [0, 0, 1, 1], [], []>} : vector<2x16xbf16>, vector<16x10xbf16>, vector<2x10xf32> -> vector<2x10xf32>
    %c1_27 = arith.constant 1 : index
    %c0_28 = arith.constant 0 : index
    %c0_29 = arith.constant 0 : index
    %62 = vector.load %arg6[%c1_27, %c0_28, %c0_29] : memref<4x2x10xf32, #tpu.memory_space<vmem>>, vector<1x2x10xf32>
    %63 = vector.shape_cast %62 : vector<1x2x10xf32> to vector<2x10xf32>
    %64 = vector.shape_cast %61 : vector<2x10xf32> to vector<1x2x10xf32>
    tpu.vector_store %arg6[%c1_27, %c0_28, %c0_29], %64 {strides = array<i32>} : memref<4x2x10xf32, #tpu.memory_space<vmem>>, vector<1x2x10xf32>,
    %cst_30 = arith.constant 0.000000e+00 : f32
    %65 = vector.broadcast %cst_30 : f32 to vector<2x16xf32>
    %66 = arith.select %11, %57, %65 : vector<2x16xi1>, vector<2x16xf32>
    %cst_31 = arith.constant dense<0.000000e+00> : vector<16xf32>
    %67 = vector.multi_reduction <add>, %66, %cst_31 [0] : vector<2x16xf32> to vector<16xf32>
    %68 = vector.shape_cast %67 : vector<16xf32> to vector<1x16xf32>
    %69 = arith.mulf %66, %66 : vector<2x16xf32>
    %cst_32 = arith.constant dense<0.000000e+00> : vector<16xf32>
    %70 = vector.multi_reduction <add>, %69, %cst_32 [0] : vector<2x16xf32> to vector<16xf32>
    %71 = vector.shape_cast %70 : vector<16xf32> to vector<1x16xf32>
    %c2 = arith.constant 2 : index
    %72 = memref.load %arg2[%c2] : memref<4xf32, #tpu.memory_space<smem>>
    %73 = vector.broadcast %72 : f32 to vector<2x16xf32>
    %74 = arith.mulf %73, %3 : vector<2x16xf32>
    %c2_33 = arith.constant 2 : index
    %75 = memref.load %arg3[%c2_33] : memref<4xf32, #tpu.memory_space<smem>>
    %76 = vector.broadcast %75 : f32 to vector<2x16xf32>
    %77 = arith.addf %74, %76 : vector<2x16xf32>
    %cst_34 = arith.constant 0.000000e+00 : f32
    %78 = vector.broadcast %cst_34 : f32 to vector<2x16xf32>
    %79 = arith.cmpf ogt, %77, %78 : vector<2x16xf32>
    %80 = math.exp %77 : vector<2x16xf32>
    %cst_35 = arith.constant 1.000000e+00 : f32
    %81 = vector.broadcast %cst_35 : f32 to vector<2x16xf32>
    %82 = arith.subf %80, %81 : vector<2x16xf32>
    %cst_36 = arith.constant 1.67326319 : f32
    %83 = vector.broadcast %cst_36 : f32 to vector<2x16xf32>
    %84 = arith.mulf %83, %82 : vector<2x16xf32>
    %85 = arith.select %79, %77, %84 : vector<2x16xi1>, vector<2x16xf32>
    %cst_37 = arith.constant 1.05070102 : f32
    %86 = vector.broadcast %cst_37 : f32 to vector<2x16xf32>
    %87 = arith.mulf %86, %85 : vector<2x16xf32>
    %88 = arith.truncf %87 : vector<2x16xf32> to vector<2x16xbf16>
    %c2_38 = arith.constant 2 : index
    %c0_39 = arith.constant 0 : index
    %c0_40 = arith.constant 0 : index
    %89 = vector.load %arg5[%c2_38, %c0_39, %c0_40] : memref<4x16x10xbf16, #tpu.memory_space<vmem>>, vector<1x16x10xbf16>
    %90 = vector.shape_cast %89 : vector<1x16x10xbf16> to vector<16x10xbf16>
    %cst_41 = arith.constant dense<0.000000e+00> : vector<2x10xf32>
    %91 = tpu.matmul %88, %90, %cst_41 {dimension_numbers = #tpu.dot_dimension_numbers<[1], [0], [0], [1], [0, 0, 1, 1], [], []>} : vector<2x16xbf16>, vector<16x10xbf16>, vector<2x10xf32> -> vector<2x10xf32>
    %c2_42 = arith.constant 2 : index
    %c0_43 = arith.constant 0 : index
    %c0_44 = arith.constant 0 : index
    %92 = vector.load %arg6[%c2_42, %c0_43, %c0_44] : memref<4x2x10xf32, #tpu.memory_space<vmem>>, vector<1x2x10xf32>
    %93 = vector.shape_cast %92 : vector<1x2x10xf32> to vector<2x10xf32>
    %94 = vector.shape_cast %91 : vector<2x10xf32> to vector<1x2x10xf32>
    tpu.vector_store %arg6[%c2_42, %c0_43, %c0_44], %94 {strides = array<i32>} : memref<4x2x10xf32, #tpu.memory_space<vmem>>, vector<1x2x10xf32>,
    %cst_45 = arith.constant 0.000000e+00 : f32
    %95 = vector.broadcast %cst_45 : f32 to vector<2x16xf32>
    %96 = arith.select %11, %87, %95 : vector<2x16xi1>, vector<2x16xf32>
    %cst_46 = arith.constant dense<0.000000e+00> : vector<16xf32>
    %97 = vector.multi_reduction <add>, %96, %cst_46 [0] : vector<2x16xf32> to vector<16xf32>
    %98 = vector.shape_cast %97 : vector<16xf32> to vector<1x16xf32>
    %99 = arith.mulf %96, %96 : vector<2x16xf32>
    %cst_47 = arith.constant dense<0.000000e+00> : vector<16xf32>
    %100 = vector.multi_reduction <add>, %99, %cst_47 [0] : vector<2x16xf32> to vector<16xf32>
    %101 = vector.shape_cast %100 : vector<16xf32> to vector<1x16xf32>
    %c3 = arith.constant 3 : index
    %102 = memref.load %arg2[%c3] : memref<4xf32, #tpu.memory_space<smem>>
    %103 = vector.broadcast %102 : f32 to vector<2x16xf32>
    %104 = arith.mulf %103, %3 : vector<2x16xf32>
    %c3_48 = arith.constant 3 : index
    %105 = memref.load %arg3[%c3_48] : memref<4xf32, #tpu.memory_space<smem>>
    %106 = vector.broadcast %105 : f32 to vector<2x16xf32>
    %107 = arith.addf %104, %106 : vector<2x16xf32>
    %cst_49 = arith.constant 0.000000e+00 : f32
    %108 = vector.broadcast %cst_49 : f32 to vector<2x16xf32>
    %109 = arith.cmpf ogt, %107, %108 : vector<2x16xf32>
    %110 = math.exp %107 : vector<2x16xf32>
    %cst_50 = arith.constant 1.000000e+00 : f32
    %111 = vector.broadcast %cst_50 : f32 to vector<2x16xf32>
    %112 = arith.subf %110, %111 : vector<2x16xf32>
    %cst_51 = arith.constant 1.67326319 : f32
    %113 = vector.broadcast %cst_51 : f32 to vector<2x16xf32>
    %114 = arith.mulf %113, %112 : vector<2x16xf32>
    %115 = arith.select %109, %107, %114 : vector<2x16xi1>, vector<2x16xf32>
    %cst_52 = arith.constant 1.05070102 : f32
    %116 = vector.broadcast %cst_52 : f32 to vector<2x16xf32>
    %117 = arith.mulf %116, %115 : vector<2x16xf32>
    %118 = arith.truncf %117 : vector<2x16xf32> to vector<2x16xbf16>
    %c3_53 = arith.constant 3 : index
    %c0_54 = arith.constant 0 : index
    %c0_55 = arith.constant 0 : index
    %119 = vector.load %arg5[%c3_53, %c0_54, %c0_55] : memref<4x16x10xbf16, #tpu.memory_space<vmem>>, vector<1x16x10xbf16>
    %120 = vector.shape_cast %119 : vector<1x16x10xbf16> to vector<16x10xbf16>
    %cst_56 = arith.constant dense<0.000000e+00> : vector<2x10xf32>
    %121 = tpu.matmul %118, %120, %cst_56 {dimension_numbers = #tpu.dot_dimension_numbers<[1], [0], [0], [1], [0, 0, 1, 1], [], []>} : vector<2x16xbf16>, vector<16x10xbf16>, vector<2x10xf32> -> vector<2x10xf32>
    %c3_57 = arith.constant 3 : index
    %c0_58 = arith.constant 0 : index
    %c0_59 = arith.constant 0 : index
    %122 = vector.load %arg6[%c3_57, %c0_58, %c0_59] : memref<4x2x10xf32, #tpu.memory_space<vmem>>, vector<1x2x10xf32>
    %123 = vector.shape_cast %122 : vector<1x2x10xf32> to vector<2x10xf32>
    %124 = vector.shape_cast %121 : vector<2x10xf32> to vector<1x2x10xf32>
    tpu.vector_store %arg6[%c3_57, %c0_58, %c0_59], %124 {strides = array<i32>} : memref<4x2x10xf32, #tpu.memory_space<vmem>>, vector<1x2x10xf32>,
    %cst_60 = arith.constant 0.000000e+00 : f32
    %125 = vector.broadcast %cst_60 : f32 to vector<2x16xf32>
    %126 = arith.select %11, %117, %125 : vector<2x16xi1>, vector<2x16xf32>
    %cst_61 = arith.constant dense<0.000000e+00> : vector<16xf32>
    %127 = vector.multi_reduction <add>, %126, %cst_61 [0] : vector<2x16xf32> to vector<16xf32>
    %128 = vector.shape_cast %127 : vector<16xf32> to vector<1x16xf32>
    %129 = arith.mulf %126, %126 : vector<2x16xf32>
    %cst_62 = arith.constant dense<0.000000e+00> : vector<16xf32>
    %130 = vector.multi_reduction <add>, %129, %cst_62 [0] : vector<2x16xf32> to vector<16xf32>
    %131 = vector.shape_cast %130 : vector<16xf32> to vector<1x16xf32>
    %132 = tpu.concatenate %38, %68, %98, %128, %41, %71, %101, %131 in 0 : vector<1x16xf32>, vector<1x16xf32>, vector<1x16xf32>, vector<1x16xf32>, vector<1x16xf32>, vector<1x16xf32>, vector<1x16xf32>, vector<1x16xf32> -> vector<8x16xf32>
    %c0_63 = arith.constant 0 : index
    %c0_64 = arith.constant 0 : index
    %133 = vector.load %arg7[%c0_63, %c0_64] : memref<8x1xf32, #tpu.memory_space<vmem>>, vector<8x1xf32>
    %cst_65 = arith.constant dense<0.000000e+00> : vector<8xf32>
    %134 = vector.multi_reduction <add>, %132, %cst_65 [1] : vector<8x16xf32> to vector<8xf32>
    %135 = vector.shape_cast %134 : vector<8xf32> to vector<8x1xf32>
    %136 = arith.addf %133, %135 : vector<8x1xf32>
    %c0_66 = arith.constant 0 : index
    %c0_67 = arith.constant 0 : index
    %137 = vector.load %arg7[%c0_66, %c0_67] : memref<8x1xf32, #tpu.memory_space<vmem>>, vector<8x1xf32>
    tpu.vector_store %arg7[%c0_66, %c0_67], %136 {strides = array<i32>} : memref<8x1xf32, #tpu.memory_space<vmem>>, vector<8x1xf32>,
    return
  }
  func.func @transform_0(%arg0: i32, %arg1: i32) -> i32 {
    %c0_i32 = arith.constant 0 : i32
    %c0_i32_0 = arith.constant 0 : i32
    return %c0_i32 : i32
  }
  func.func @transform_1(%arg0: i32, %arg1: i32) -> i32 {
    %c0_i32 = arith.constant 0 : i32
    %c0_i32_0 = arith.constant 0 : i32
    return %c0_i32 : i32
  }
  func.func @transform_2(%arg0: i32, %arg1: i32) -> (i32, i32) {
    %c1_i32 = arith.constant 1 : i32
    %0 = arith.muli %arg0, %c1_i32 : i32
    %1 = arith.addi %0, %arg1 : i32
    %c0_i32 = arith.constant 0 : i32
    %c0_i32_0 = arith.constant 0 : i32
    return %1, %c0_i32 : i32, i32
  }
  func.func @transform_3(%arg0: i32, %arg1: i32) -> (i32, i32, i32) {
    %c0_i32 = arith.constant 0 : i32
    %c0_i32_0 = arith.constant 0 : i32
    %c0_i32_1 = arith.constant 0 : i32
    %c0_i32_2 = arith.constant 0 : i32
    return %c0_i32, %c0_i32_0, %c0_i32_1 : i32, i32, i32
  }
  func.func @transform_4(%arg0: i32, %arg1: i32) -> (i32, i32, i32) {
    %c1_i32 = arith.constant 1 : i32
    %0 = arith.muli %arg0, %c1_i32 : i32
    %1 = arith.addi %0, %arg1 : i32
    %c0_i32 = arith.constant 0 : i32
    %c0_i32_0 = arith.constant 0 : i32
    %c0_i32_1 = arith.constant 0 : i32
    return %c0_i32, %1, %c0_i32_0 : i32, i32, i32
  }
  func.func @transform_5(%arg0: i32, %arg1: i32) -> (i32, i32) {
    %c0_i32 = arith.constant 0 : i32
    %c0_i32_0 = arith.constant 0 : i32
    return %arg0, %c0_i32 : i32, i32
  }
}

</mosaic_0001>

<bundles_post_ra>
// kernel: tpu_custom_call.1
= control target key start
LH: loop header
LB: loop body
LE: loop exit
PB: predicated region body
PF: predicated region fallthrough
CT: control target
= control target key end

     0   :  { %11 = vsyncpa [#allocation4], 0  ;;  %s704_s0 = inlined_call_operand.vmem [shape: f32[4], index: 0, kind: input, shape index: {}]   ;;  %s705_s1 = inlined_call_operand.vmem [shape: f32[4], index: 1, kind: input, shape index: {}]   ;;  %s706_s2 = inlined_call_operand.vmem [shape: f32[2,16], index: 2, kind: input, shape index: {}]   ;;  %s707_s3 = inlined_call_operand.vmem [shape: bf16[4,16,10], index: 3, kind: input, shape index: {}]   ;;  %s708_s4 = inlined_call_operand.hbm [shape: f32[4,2,10], index: 4, kind: output, shape index: {0}]   ;;  %s709_s5 = inlined_call_operand.vmem [shape: f32[8,1], index: 5, kind: output, shape index: {1}]  }
   0x1   :  { %12 = vsyncpa [#allocation6], 0 }
   0x2   :  { %13 = vsyncpa [#allocation3], 0  ;;  %s20_s20 = sshll.u32 %s704_s0, 4  ;;  %s30_s23 = sshll.u32 %s705_s1, 4  ;;  %s21_s20 = int_to_ptr.vmem [resolvable:$true] %s20_s20  ;;  %s31_s23 = int_to_ptr.vmem [resolvable:$true] %s30_s23 }
   0x3   :  { %s542_s24 = scalar_lea.vmem %s21_s20, 16  ;;  %p547_p1 = scmp.lt.s32.totalorder %s21_s20, %s21_s20 }
   0x4   :  { %p543_p0 = scmp.ne.s32.totalorder %s21_s20, %s542_s24  ;;  %p548_p2 = scmp.lt.s32.totalorder %s542_s24, %s542_s24 }
   0x6   :  { %p549_p3 = por %p548_p2, %p547_p1 }
   0x8   :  { %p550_p4 = pnand %p549_p3, %p543_p0 }
   0xa   :  { %553 = shalt.err (!%p550_p4)
}
   0xb   :  { %s592_s25 = smov [#allocation2]   ;;  %s554_s26 = scalar_lea.vmem %s31_s23, 16 }
   0xc   :  { %23 = dma.vmem_to_smem %s21_s20, 16, %s592_s25, [#allocation4]  }
   0xd   :  { %p555_p5 = scmp.ne.s32.totalorder %s31_s23, %s554_s26  ;;  %p559_p6 = scmp.lt.s32.totalorder %s31_s23, %s31_s23 }
   0xe   :  { %p560_p7 = scmp.lt.s32.totalorder %s554_s26, %s554_s26 }
  0x10   :  { %p561_p8 = por %p560_p7, %p559_p6 }
  0x12   :  { %p562_p9 = pnand %p561_p8, %p555_p5 }
  0x14   :  { %565 = shalt.err (!%p562_p9)
}
  0x15   :  { %s593_s0 = smov [#allocation5]  }
  0x16   :  { %33 = dma.vmem_to_smem %s31_s23, 16, %s593_s0, [#allocation6]  }
  0x17   :  { %586 = dma.done.wait [#allocation4], 16  }
  0x18   :  { %587 = vsyncadd [#allocation4], 4294967280 }
  0x19   :  { %588 = dma.done.wait [#allocation6], 16  }
  0x1a   :  { %589 = vsyncadd [#allocation6], 4294967280 }
  0x1b   :  { %50 = sfence }
  0x1c   :  { %v530_v0 = vld [vmem:[%s707_s3] sm:$0xff]   ;;  %v594_v1 = vmov 0.0   ;;  %v531_v2 = vld [vmem:[%s707_s3 + $0x8] sm:$0xff]   ;;  %vm595_vm0 = vmmov 0   ;;  %s78_s30 = sld [smem:[#allocation2]]  ;;  %v73_v24 = vlaneseq  ;;  %vm147_vm4 = vcmask 123904  }
  0x1d   :  { %499 = vmatprep.subr.bf16.mxu0 %v594_v1  ;;  %505 = vmatprep.subr.bf16.mxu1 %v594_v1  ;;  %s81_s6 = sld [smem:[#allocation5]]  ;;  %v70_v3 = vld [vmem:[%s706_s2] sm:$0x3]  ;;  %vm100_vm6 = vcmask 130048   ;;  %v532_v38 = vld [vmem:[%s707_s3 + $0x10] sm:$0xff]   ;;  %v533_v46 = vld [vmem:[%s707_s3 + $0x18] sm:$0xff]  }
  0x1e   :  { %500 = vmatpush3.bf16.msra.mxu0 %v530_v0  ;;  %501 = vmatprep.mubr.msk.bf16.mxu0 %vm595_vm0, %v594_v1  ;;  %s470_s7 = sld [smem:[#allocation2 + $0x1]]  ;;  %v652_v26 = vshrl.u32 %v73_v24, 7  ;;  %vm415_vm8 = vcmask 1040384   ;;  %vm417_vm9 = vcmask 1041408   ;;  %vm419_vm10 = vcmask 1042432   ;;  %s596_s23 = smov [#allocation7]  }
  0x1f   :  { %506 = vmatpush3.bf16.msra.mxu1 %v531_v2  ;;  %507 = vmatprep.mubr.msk.bf16.mxu1 %vm595_vm0, %v594_v1  ;;  %s471_s8 = sld [smem:[#allocation5 + $0x1]]  ;;  %vm421_vm11 = vcmask 1043456   ;;  %vm423_vm12 = vcmask 1044480   ;;  %vm425_vm13 = vcmask 1045504   ;;  %vm427_vm14 = vcmask 1046528   ;;  %s444_s24 = sshll.u32 %s596_s23, 4  ;;  %s445_s24 = int_to_ptr.vmem [resolvable:$true] %s444_s24 }
  0x20   :  { %511 = vmatprep.subr.bf16.mxu0 %v594_v1  ;;  %517 = vmatprep.subr.bf16.mxu1 %v594_v1  ;;  %s477_s11 = sld [smem:[#allocation2 + $0x2]]  ;;  %vm77_vm3 = vcmp.lt.s32.totalorder %v652_v26, 2  ;;  %vm68_vm15 = vcmask 7168   ;;  %p571_p11 = scmp.lt.s32.totalorder %s445_s24, %s445_s24 }
  0x21   :  { %s478_s12 = sld [smem:[#allocation5 + $0x2]]  ;;  %69 = vst.msk [vmem:[%s709_s5] sm:$0xff] %vm68_vm15, %v594_v1 }
  0x22   :  { %v79_v4 = vstv %s78_s30  ;;  %s484_s13 = sld [smem:[#allocation2 + $0x3]] }
  0x23   :  { %v80_v5 = vmul.f32 %v79_v4, %v70_v3  ;;  %v82_v6 = vstv %s81_s6  ;;  %s485_s14 = sld [smem:[#allocation5 + $0x3]] }
  0x24   :  { %v164_v7 = vstv %s470_s7 }
  0x25   :  { %v83_v8 = vadd.f32 %v82_v6, %v80_v5  ;;  %v165_v9 = vmul.f32 %v164_v7, %v70_v3  ;;  %v167_v10 = vstv %s471_s8 }
  0x26   :  { %v248_v11 = vstv %s477_s11 }
  0x27   :  { %v85_v12 = vmul.f32 1.442695, %v83_v8  ;;  %v168_v13 = vadd.f32 %v167_v10, %v165_v9  ;;  %v249_v14 = vmul.f32 %v248_v11, %v70_v3  ;;  %v251_v15 = vstv %s478_s12 }
  0x28   :  { %v332_v16 = vstv %s484_s13  ;;  %vm84_vm1 = vcmp.gt.f32.partialorder %v83_v8, 0.0 }
  0x29   :  { %534 = vpow2.f32 %v85_v12  ;;  %v170_v17 = vmul.f32 1.442695, %v168_v13  ;;  %v252_v18 = vadd.f32 %v251_v15, %v249_v14  ;;  %v333_v19 = vmul.f32 %v332_v16, %v70_v3 }
  0x2a   :  { %v335_v20 = vstv %s485_s14  ;;  %vm169_vm2 = vcmp.gt.f32.partialorder %v168_v13, 0.0 }
  0x2b   :  { %536 = vpow2.f32 %v170_v17  ;;  %v254_v21 = vmul.f32 1.442695, %v252_v18  ;;  %v336_v22 = vadd.f32 %v335_v20, %v333_v19  ;;  %vm253_vm5 = vcmp.gt.f32.partialorder %v252_v18, 0.0 }
  0x2d   :  { %538 = vpow2.f32 %v254_v21  ;;  %v338_v23 = vmul.f32 1.442695, %v336_v22  ;;  %vm337_vm7 = vcmp.gt.f32.partialorder %v336_v22, 0.0 }
  0x2f   :  { %540 = vpow2.f32 %v338_v23 }
  0x36   :  { %v535_v25 = vpop.eup %534 }
  0x37   :  { %v467_v27 = vadd.f32 -1.0, %v535_v25 }
  0x38   :  { %v537_v28 = vpop.eup %536 }
  0x39   :  { %v88_v29 = vmul.f32 1.6732632, %v467_v27  ;;  %v472_v30 = vadd.f32 -1.0, %v537_v28 }
  0x3a   :  { %v539_v31 = vpop.eup %538 }
  0x3b   :  { %v89_v32 = vsel %vm84_vm1, %v83_v8, %v88_v29  ;;  %v173_v33 = vmul.f32 1.6732632, %v472_v30  ;;  %v479_v34 = vadd.f32 -1.0, %v539_v31 }
  0x3c   :  { %v90_v35 = vmul.f32 1.050701, %v89_v32  ;;  %v541_v36 = vpop.eup %540 }
  0x3d   :  { %v174_v37 = vsel %vm169_vm2, %v168_v13, %v173_v33  ;;  %v257_v39 = vmul.f32 1.6732632, %v479_v34  ;;  %v486_v43 = vadd.f32 -1.0, %v541_v36 }
  0x3e   :  { %v91_v40 = vpack.c.bf16 %v90_v35, %v90_v35  ;;  %v146_v41 = vsel %vm77_vm3, %v90_v35, 0.0  ;;  %v175_v42 = vmul.f32 1.050701, %v174_v37 }
  0x3f   :  { %v148_v44 = vsel %vm147_vm4, %v146_v41, 0.0  ;;  %v155_v45 = vmul.f32 %v146_v41, %v146_v41  ;;  %v258_v47 = vsel %vm253_vm5, %v252_v18, %v257_v39  ;;  %v341_v55 = vmul.f32 1.6732632, %v486_v43 }
  0x40   :  { %502 = vmatmul.mubr.msk.bf16.vlgmr.msra.gmra.mxu0 %vm100_vm6, %v91_v40  ;;  %v149_v48 = vrot.slane %v148_v44, 4  ;;  %v176_v49 = vpack.c.bf16 %v175_v42, %v175_v42  ;;  %v231_v50 = vsel %vm77_vm3, %v175_v42, 0.0  ;;  %v259_v51 = vmul.f32 1.050701, %v258_v47 }
  0x41   :  { %v156_v52 = vsel %vm147_vm4, %v155_v45, 0.0  ;;  %v232_v53 = vsel %vm147_vm4, %v231_v50, 0.0  ;;  %v239_v54 = vmul.f32 %v231_v50, %v231_v50  ;;  %512 = vmatpush3.bf16.msra.mxu0 %v532_v38  ;;  %513 = vmatprep.mubr.msk.bf16.mxu0 %vm595_vm0, %v594_v1  ;;  %v342_v61 = vsel %vm337_vm7, %v336_v22, %v341_v55 }
  0x42   :  { %v150_v56 = vadd.f32 %v149_v48, %v148_v44  ;;  %v157_v57 = vrot.slane %v156_v52, 4  ;;  %508 = vmatmul.mubr.msk.bf16.vlgmr.msra.gmra.mxu1 %vm100_vm6, %v176_v49  ;;  %v233_v58 = vrot.slane %v232_v53, 4  ;;  %v260_v60 = vpack.c.bf16 %v259_v51, %v259_v51 }
  0x43   :  { %v240_v59 = vsel %vm147_vm4, %v239_v54, 0.0  ;;  %518 = vmatpush3.bf16.msra.mxu1 %v533_v46  ;;  %519 = vmatprep.mubr.msk.bf16.mxu1 %vm595_vm0, %v594_v1  ;;  %v315_v62 = vsel %vm77_vm3, %v259_v51, 0.0  ;;  %v343_v4 = vmul.f32 1.050701, %v342_v61  ;;  %v429_v61 = vld [vmem:[%s709_s5] sm:$0xff]  ;;  %vm144_vm0 = vcmask 74752  }
  0x44   :  { %v151_v63 = vrot.slane %v150_v56, 2  ;;  %v158_v0 = vadd.f32 %v157_v57, %v156_v52  ;;  %v234_v2 = vadd.f32 %v233_v58, %v232_v53  ;;  %v241_v3 = vrot.slane %v240_v59, 4 }
  0x45   :  { %v316_v5 = vsel %vm147_vm4, %v315_v62, 0.0  ;;  %v323_v6 = vmul.f32 %v315_v62, %v315_v62  ;;  %v344_v10 = vpack.c.bf16 %v343_v4, %v343_v4  ;;  %v399_v13 = vsel %vm77_vm3, %v343_v4, 0.0 }
  0x46   :  { %v152_v7 = vadd.f32 %v151_v63, %v150_v56  ;;  %v235_v8 = vrot.slane %v234_v2, 2  ;;  %v242_v9 = vadd.f32 %v241_v3, %v240_v59  ;;  %v317_v11 = vrot.slane %v316_v5, 4 }
  0x47   :  { %v324_v12 = vsel %vm147_vm4, %v323_v6, 0.0  ;;  %v159_v16 = vrot.slane %v158_v0, 2  ;;  %v400_v20 = vsel %vm147_vm4, %v399_v13, 0.0  ;;  %v407_v21 = vmul.f32 %v399_v13, %v399_v13 }
  0x48   :  { %v153_v14 = vrot.slane %v152_v7, 1  ;;  %v236_v15 = vadd.f32 %v235_v8, %v234_v2  ;;  %514 = vmatmul.mubr.msk.bf16.vlgmr.msra.gmra.mxu0 %vm100_vm6, %v260_v60  ;;  %v243_v17 = vrot.slane %v242_v9, 2  ;;  %v318_v18 = vadd.f32 %v317_v11, %v316_v5 }
  0x49   :  { %v325_v19 = vrot.slane %v324_v12, 4  ;;  %v401_v25 = vrot.slane %v400_v20, 4  ;;  %v408_v26 = vsel %vm147_vm4, %v407_v21, 0.0  ;;  %v160_v28 = vadd.f32 %v159_v16, %v158_v0 }
  0x4a   :  { %v237_v22 = vrot.slane %v236_v15, 1  ;;  %520 = vmatmul.mubr.msk.bf16.vlgmr.msra.gmra.mxu1 %vm100_vm6, %v344_v10  ;;  %v319_v23 = vrot.slane %v318_v18, 2  ;;  %v154_v27 = vadd.f32 %v153_v14, %v152_v7  ;;  %v244_v29 = vadd.f32 %v243_v17, %v242_v9 }
  0x4b   :  { %v326_v24 = vadd.f32 %v325_v19, %v324_v12  ;;  %v409_v30 = vrot.slane %v408_v26, 4  ;;  %v402_v34 = vadd.f32 %v401_v25, %v400_v20  ;;  %v161_v39 = vrot.slane %v160_v28, 1 }
  0x4c   :  { %v238_v31 = vadd.f32 %v237_v22, %v236_v15  ;;  %v320_v32 = vadd.f32 %v319_v23, %v318_v18  ;;  %v245_v41 = vrot.slane %v244_v29, 1 }
  0x4d   :  { %v327_v33 = vrot.slane %v326_v24, 2  ;;  %v410_v35 = vadd.f32 %v409_v30, %v408_v26  ;;  %v403_v38 = vrot.slane %v402_v34, 2  ;;  %v162_v48 = vadd.f32 %v161_v39, %v160_v28 }
  0x4e   :  { %v321_v36 = vrot.slane %v320_v32, 1  ;;  %v416_v44 = vsel %vm415_vm8, %v154_v27, %v238_v31  ;;  %v246_v51 = vadd.f32 %v245_v41, %v244_v29 }
  0x4f   :  { %v328_v37 = vadd.f32 %v327_v33, %v326_v24  ;;  %v411_v40 = vrot.slane %v410_v35, 2  ;;  %v404_v43 = vadd.f32 %v403_v38, %v402_v34 }
  0x50   :  { %v322_v42 = vadd.f32 %v321_v36, %v320_v32 }
  0x51   :  { %v329_v45 = vrot.slane %v328_v37, 1  ;;  %v412_v46 = vadd.f32 %v411_v40, %v410_v35  ;;  %v405_v47 = vrot.slane %v404_v43, 1 }
  0x52   :  { %v418_v50 = vsel %vm417_vm9, %v416_v44, %v322_v42 }
  0x53   :  { %v413_v49 = vrot.slane %v412_v46, 1  ;;  %v406_v52 = vadd.f32 %v405_v47, %v404_v43  ;;  %v330_v53 = vadd.f32 %v329_v45, %v328_v37 }
  0x55   :  { %v414_v54 = vadd.f32 %v413_v49, %v412_v46  ;;  %v420_v55 = vsel %vm419_vm10, %v418_v50, %v406_v52 }
  0x56   :  { %v422_v56 = vsel %vm421_vm11, %v420_v55, %v162_v48 }
  0x57   :  { %v424_v57 = vsel %vm423_vm12, %v422_v56, %v246_v51 }
  0x58   :  { %v426_v58 = vsel %vm425_vm13, %v424_v57, %v330_v53 }
  0x59   :  { %v428_v59 = vsel %vm427_vm14, %v426_v58, %v414_v54 }
  0x5a   :  { %v430_v60 = vsel %vm100_vm6, %v428_v59, 0.0 }
  0x5b   :  { %431 = vadd.xlane.f32.xlu0 %v430_v60 }
  0xe4   :  { %v432_v62 = vpop.xlane.xlu0 %431 }
  0xe5   :  { %v433_v63 = vadd.f32 %v432_v62, %v429_v61 }
  0xe7   :  { %435 = vst.msk [vmem:[%s709_s5] sm:$0xff] %vm68_vm15, %v433_v63  ;;  %s566_s5 = scalar_lea.vmem %s445_s24, 128 }
  0xe8   :  { %p567_p10 = scmp.ne.s32.totalorder %s445_s24, %s566_s5  ;;  %p572_p12 = scmp.lt.s32.totalorder %s566_s5, %s566_s5 }
  0xea   :  { %p573_p13 = por %p572_p12, %p571_p11 }
  0xec   :  { %p574_p0 = pnand %p573_p13, %p567_p10 }
 0x100   :  { %v138_v0 = vpop.f32.mrf.mxu0 }
 0x101   :  { %145 = vst.msk [vmem:[#allocation7] sm:$0x3] %vm144_vm0, %v138_v0 }
 0x102   :  { %v223_v2 = vpop.f32.mrf.mxu1  ;;  %v503_v3 = vpop.f32.mrf.mxu0 }
 0x103   :  { %230 = vst.msk [vmem:[#allocation7 + $0x2] sm:$0x3] %vm144_vm0, %v223_v2 }
 0x104   :  { %v509_v4 = vpop.f32.mrf.mxu1  ;;  %v141_v1 = vpop.f32.mrf.mxu0 }
 0x106   :  { %v226_v5 = vpop.f32.mrf.mxu1  ;;  %v504_v6 = vpop.f32.mrf.mxu0 }
 0x108   :  { %v510_v7 = vpop.f32.mrf.mxu1  ;;  %v307_v8 = vpop.f32.mrf.mxu0 }
 0x109   :  { %314 = vst.msk [vmem:[#allocation7 + $0x4] sm:$0x3] %vm144_vm0, %v307_v8 }
 0x10a   :  { %v391_v9 = vpop.f32.mrf.mxu1  ;;  %v515_v10 = vpop.f32.mrf.mxu0 }
 0x10b   :  { %398 = vst.msk [vmem:[#allocation7 + $0x6] sm:$0x3] %vm144_vm0, %v391_v9 }
 0x10c   :  { %v521_v11 = vpop.f32.mrf.mxu1  ;;  %v310_v12 = vpop.f32.mrf.mxu0 }
 0x10d   :  { %577 = shalt.err (!%p574_p0)
}
 0x10e   :  { %s597_s25 = smov 32   ;;  %s598_s26 = smov 2   ;;  %v394_v13 = vpop.f32.mrf.mxu1  ;;  %v516_v14 = vpop.f32.mrf.mxu0 }
 0x10f   :  { %450 = dma.vmem_to_hbm [thread:$0]  %s445_s24, 128, %s708_s4, [#allocation3], %s597_s25, %s597_s25, %s598_s26  }
 0x110   :  { %v522_v15 = vpop.f32.mrf.mxu1 }
 0x111   :  { %590 = dma.done.wait [#allocation3], 128  }
 0x112   :  { %591 = vsyncadd [#allocation3], 4294967168 }
 0x113   :  { %458 = vsyncpa [#allocation3], 1 }
 0x114   :  { %459 = vsyncpa [#allocation4], 1 }
 0x115   :  { %460 = vsyncpa [#allocation6], 1 }

</bundles_post_ra>
